<compile_context>
chip_gen: v7x
topology: tpu7x:2x2x1
jax: 0.10.0
libtpu: 0.0.40
codegen_flags: <defaults>
</compile_context>

<pallas_src>
import jax
import jax.numpy as jnp
from jax.experimental import pallas as pl
from jax.experimental.pallas import tpu as pltpu

_LANE = 128  # vreg lane width = register-blocked count-chunk width = MXU contraction chunk


def _round_up(x, m):
    return (x + m - 1) // m * m


def _count_chunk(idx, iota):
    """counts[t, l] = #{ code columns j : idx[t, j] == iota[t, l] } for one 128-lane chunk.

    The (TB, 128) f32 accumulator stays vreg-resident across all code columns."""
    tb, ncols = idx.shape
    counts = jnp.zeros(iota.shape, jnp.float32)
    if ncols <= 32:
        # Small, fixed code count: static unroll.
        for j in range(ncols):
            counts = counts + (idx[:, j:j + 1] == iota).astype(jnp.float32)
    else:
        # Large code count: keep the scheduler window / vreg live ranges bounded.
        def body(j, c):
            col = jax.lax.dynamic_slice(idx, (0, j), (tb, 1))
            return c + (col == iota).astype(jnp.float32)
        counts = jax.lax.fori_loop(0, ncols, body, counts, unroll=4)
    return counts


def _fused_logreg_kernel(idx_d_ref, idx_p_ref, m_d_ref, m_p_ref, b_ref,
                         o_ref, acc_ref):
    """One (batch-tile i, vocab-tile v) grid step.

    idx_d_ref / idx_p_ref : (TB, V*C) int32  diagnosis / procedure code ids
    m_d_ref   / m_p_ref   : (TV, KP)        fused (E @ W_half / C) table tile (f32 or bf16)
    b_ref                 : (1, KP) f32     bias
    o_ref                 : (TB, KP) f32    logits
    acc_ref               : (TB, KP) f32    scratch accumulator, resident across the v axis
    """
    v = pl.program_id(1)

    @pl.when(v == 0)
    def _():
        acc_ref[...] = jnp.zeros_like(acc_ref)

    tb = idx_d_ref.shape[0]
    tv = m_d_ref.shape[0]
    vbase = v * tv                       # element offset of this table tile in padded vocab

    idx_d = idx_d_ref[...]
    idx_p = idx_p_ref[...]

    # Register-blocked count build + immediate MXU dot, one 128-lane sub-chunk at a time.
    # Diag and proc counts are built against the SAME vocab-wide iota (half the compare
    # width of a stacked 2*VOCAB table) and both dots accumulate into acc_ref.
    for s in range(tv // _LANE):
        lo = vbase + s * _LANE
        iota = jax.lax.broadcasted_iota(jnp.int32, (tb, _LANE), 1) + lo
        m_d = m_d_ref[s * _LANE:(s + 1) * _LANE, :]
        m_p = m_p_ref[s * _LANE:(s + 1) * _LANE, :]

        cd = _count_chunk(idx_d, iota)
        acc_ref[...] += jnp.dot(cd.astype(m_d.dtype), m_d,
                                preferred_element_type=jnp.float32)
        cp = _count_chunk(idx_p, iota)
        acc_ref[...] += jnp.dot(cp.astype(m_p.dtype), m_p,
                                preferred_element_type=jnp.float32)

    @pl.when(v == pl.num_programs(1) - 1)
    def _():
        o_ref[...] = acc_ref[...] + b_ref[...]


def embedded_logreg_forward(diag_idx, proc_idx, embedding, linear_w_t, linear_b,
                            *, gemm_dtype=jnp.float32):
    """diag_idx/proc_idx: int32 [B,V,C]; embedding: [VOCAB,D];
       linear_w_t: [2*D,K] (torch weight transposed); linear_b: [K]. Returns f32 [B,K]."""
    B, V, C = diag_idx.shape
    vocab, D = embedding.shape
    K = linear_w_t.shape[1]

    # ---- host-side exact fusion: frozen embedding and the 1/C code-mean folded into two
    #      (VOCAB, K) classifier tables (diag half / proc half kept separate) ----
    emb_scaled = embedding.astype(jnp.float32) * (1.0 / C)
    m_d = emb_scaled @ linear_w_t[:D].astype(jnp.float32)          # (VOCAB, K)
    m_p = emb_scaled @ linear_w_t[D:].astype(jnp.float32)          # (VOCAB, K)

    # Vocab streamed over a reduction grid axis in TV-row tiles; output lane-dense (KP=128k).
    tv = min(512, _round_up(vocab, _LANE))
    vocab_p = _round_up(vocab, tv)
    kp = _round_up(K, _LANE)

    # NOTE: bf16 here rounds the fused weights (logit error grows) — counts remain exact.
    m_d_pad = jnp.zeros((vocab_p, kp), gemm_dtype).at[:vocab, :K].set(m_d.astype(gemm_dtype))
    m_p_pad = jnp.zeros((vocab_p, kp), gemm_dtype).at[:vocab, :K].set(m_p.astype(gemm_dtype))
    bias_pad = jnp.zeros((1, kp), jnp.float32).at[0, :K].set(linear_b.astype(jnp.float32))

    vc = V * C
    idx_d = diag_idx.reshape(B, vc).astype(jnp.int32)
    idx_p = proc_idx.reshape(B, vc).astype(jnp.int32)
    # No bounds check in-kernel: ids must lie in [0, vocab); ids in [vocab, vocab_p] match a
    # zero table row (or nothing) and silently contribute 0.

    # Batch tile: multiple of 8 sublanes, <= 256 (MXU M height), and sized so the parallel
    # batch axis gets >= 2 grid steps whenever B allows it (v7x has 2 TensorCores).
    tb = min(256, _round_up(max((B + 1) // 2, 1), 8))
    b_pad = _round_up(B, tb)
    # Padded batch rows use an out-of-vocab id: they match nothing, output only the bias,
    # and are sliced off below (the padded region is never reused / aliased).
    idx_d = jnp.pad(idx_d, ((0, b_pad - B), (0, 0)), constant_values=vocab_p)
    idx_p = jnp.pad(idx_p, ((0, b_pad - B), (0, 0)), constant_values=vocab_p)

    grid = (b_pad // tb, vocab_p // tv)

    # Explicit VMEM budget from the actual buffers (pipelined inputs/outputs double-buffered,
    # one accumulator scratch), clamped to [32 MiB default, 64 MiB v7x physical].
    itemsize = jnp.dtype(gemm_dtype).itemsize
    vmem_bytes = (2 * (tb * vc * 4) * 2            # idx_d + idx_p tiles, double-buffered
                  + 2 * (tv * kp * itemsize) * 2   # m_d + m_p table tiles, double-buffered
                  + (kp * 4) * 2                   # bias
                  + (tb * kp * 4) * 2              # output tile
                  + tb * kp * 4)                   # accumulator scratch
    vmem_limit = max(32 << 20, min(int(1.5 * vmem_bytes) + (1 << 20), 64 << 20))

    out = pl.pallas_call(
        _fused_logreg_kernel,
        out_shape=jax.ShapeDtypeStruct((b_pad, kp), jnp.float32),
        grid_spec=pltpu.PrefetchScalarGridSpec(
            num_scalar_prefetch=0,
            grid=grid,
            in_specs=[
                pl.BlockSpec((tb, vc), lambda i, v: (i, 0)),     # diag ids (per batch tile)
                pl.BlockSpec((tb, vc), lambda i, v: (i, 0)),     # proc ids (per batch tile)
                pl.BlockSpec((tv, kp), lambda i, v: (v, 0)),     # diag table tile (streamed)
                pl.BlockSpec((tv, kp), lambda i, v: (v, 0)),     # proc table tile (streamed)
                pl.BlockSpec((1, kp), lambda i, v: (0, 0)),      # bias (tiny, grid-invariant)
            ],
            out_specs=pl.BlockSpec((tb, kp), lambda i, v: (i, 0)),
            scratch_shapes=[pltpu.VMEM((tb, kp), jnp.float32)],
        ),
        compiler_params=pltpu.CompilerParams(
            dimension_semantics=("parallel", "arbitrary"),       # batch parallel, vocab reduce
            vmem_limit_bytes=vmem_limit,
        ),
    )(idx_d, idx_p, m_d_pad, m_p_pad, bias_pad)

    return out[:B, :K]


def reference_forward(diag_idx, proc_idx, embedding, linear_w_t, linear_b):
    def pool(idx):
        e = embedding[idx]                       # (B, V, C, D)
        return e.mean(axis=2).sum(axis=1)        # (B, D)
    feat = jnp.concatenate([pool(diag_idx), pool(proc_idx)], axis=-1)  # (B, 2D)
    return feat @ linear_w_t + linear_b[None, :]


if __name__ == "__main__":
    # Small shapes consistent with the module's forward.
    B, V, C = 2, 4, 3          # samples, visits per sample, codes per visit
    VOCAB, D = 32, 16          # embedding table
    K = 5                      # n_class

    key = jax.random.PRNGKey(0)
    k_emb, k_d, k_p, k_w, k_b = jax.random.split(key, 5)

    # Deterministic parameter init (synthetic; embedding "pretrained" & frozen).
    embedding = jax.random.normal(k_emb, (VOCAB, D), dtype=jnp.float32)
    bound = 1.0 / jnp.sqrt(2.0 * D)
    linear_w = jax.random.uniform(k_w, (K, 2 * D), minval=-bound, maxval=bound,
                                  dtype=jnp.float32)        # torch layout (K, 2D)
    linear_w_t = linear_w.T                                  # (2D, K) for kernel
    linear_b = jax.random.uniform(k_b, (K,), minval=-bound, maxval=bound,
                                  dtype=jnp.float32)

    diag_idx = jax.random.randint(k_d, (B, V, C), 0, VOCAB, dtype=jnp.int32)
    proc_idx = jax.random.randint(k_p, (B, V, C), 0, VOCAB, dtype=jnp.int32)

    out = embedded_logreg_forward(diag_idx, proc_idx, embedding,
                                  linear_w_t, linear_b)
    out = jax.block_until_ready(out)

    ref = reference_forward(diag_idx, proc_idx, embedding, linear_w_t, linear_b)
    assert out.shape == (B, K)
    assert jnp.allclose(out, ref, atol=1e-4, rtol=1e-4), (out, ref)

    print("KERNEL_OK")
</pallas_src>

<mosaic_0001>
module attributes {stable_mosaic.version = 11 : i64} {
  func.func @_fused_logreg_kernel(%arg0: i32, %arg1: i32, %arg2: memref<8x12xi32, #tpu.memory_space<vmem>>, %arg3: memref<8x12xi32, #tpu.memory_space<vmem>>, %arg4: memref<128x128xf32, #tpu.memory_space<vmem>>, %arg5: memref<128x128xf32, #tpu.memory_space<vmem>>, %arg6: memref<1x128xf32, #tpu.memory_space<vmem>>, %arg7: memref<8x128xf32, #tpu.memory_space<vmem>>, %arg8: memref<8x128xf32, #tpu.memory_space<vmem>>) attributes {dimension_semantics = [#tpu.dimension_semantics<parallel>, #tpu.dimension_semantics<arbitrary>], iteration_bounds = array<i64: 1, 1>, scalar_prefetch = 0 : i64, scratch_operands = 1 : i64, tpu.core_type = #tpu.core_type<tc>, window_params = [{transform_indices = @transform_0, window_bounds = array<i64: 8, 12>}, {transform_indices = @transform_1, window_bounds = array<i64: 8, 12>}, {transform_indices = @transform_2, window_bounds = array<i64: 128, 128>}, {transform_indices = @transform_3, window_bounds = array<i64: 128, 128>}, {pipeline_mode = #tpu.pipeline_mode<synchronous>, transform_indices = @transform_4, window_bounds = array<i64: 1, 128>}, {transform_indices = @transform_5, window_bounds = array<i64: 8, 128>}]} {
    %c0_i32 = arith.constant 0 : i32
    %0 = arith.cmpi eq, %arg1, %c0_i32 : i32
    %1 = arith.extui %0 : i1 to i32
    %c0_i32_0 = arith.constant 0 : i32
    %2 = arith.cmpi ne, %1, %c0_i32_0 : i32
    scf.if %2 {
      %cst_22 = arith.constant 0.000000e+00 : f32
      %169 = vector.broadcast %cst_22 : f32 to vector<8x128xf32>
      %c0_23 = arith.constant 0 : index
      %c0_24 = arith.constant 0 : index
      %170 = vector.load %arg8[%c0_23, %c0_24] : memref<8x128xf32, #tpu.memory_space<vmem>>, vector<8x128xf32>
      tpu.vector_store %arg8[%c0_23, %c0_24], %169 {strides = array<i32>} : memref<8x128xf32, #tpu.memory_space<vmem>>, vector<8x128xf32>,
    } else {
    }
    %c128_i32 = arith.constant 128 : i32
    %3 = arith.muli %arg1, %c128_i32 : i32
    %c0 = arith.constant 0 : index
    %c0_1 = arith.constant 0 : index
    %4 = vector.load %arg2[%c0, %c0_1] : memref<8x12xi32, #tpu.memory_space<vmem>>, vector<8x12xi32>
    %c0_2 = arith.constant 0 : index
    %c0_3 = arith.constant 0 : index
    %5 = vector.load %arg3[%c0_2, %c0_3] : memref<8x12xi32, #tpu.memory_space<vmem>>, vector<8x12xi32>
    %c0_i32_4 = arith.constant 0 : i32
    %6 = arith.addi %3, %c0_i32_4 : i32
    %7 = tpu.iota {dimensions = array<i32: 1>} : vector<8x128xi32>
    %8 = vector.broadcast %6 : i32 to vector<8x128xi32>
    %9 = arith.addi %7, %8 : vector<8x128xi32>
    %c0_5 = arith.constant 0 : index
    %c0_6 = arith.constant 0 : index
    %10 = vector.load %arg4[%c0_5, %c0_6] : memref<128x128xf32, #tpu.memory_space<vmem>>, vector<128x128xf32>
    %c0_7 = arith.constant 0 : index
    %c0_8 = arith.constant 0 : index
    %11 = vector.load %arg5[%c0_7, %c0_8] : memref<128x128xf32, #tpu.memory_space<vmem>>, vector<128x128xf32>
    %cst = arith.constant 0.000000e+00 : f32
    %12 = vector.broadcast %cst : f32 to vector<8x128xf32>
    %13 = vector.extract_strided_slice %4 {offsets = [0, 0], sizes = [8, 1], strides = [1, 1]} : vector<8x12xi32> to vector<8x1xi32>
    %14 = vector.broadcast %13 : vector<8x1xi32> to vector<8x128xi32>
    %15 = arith.cmpi eq, %14, %9 : vector<8x128xi32>
    %16 = arith.extui %15 : vector<8x128xi1> to vector<8x128xi32>
    %17 = arith.sitofp %16 : vector<8x128xi32> to vector<8x128xf32>
    %18 = arith.addf %12, %17 : vector<8x128xf32>
    %19 = vector.extract_strided_slice %4 {offsets = [0, 1], sizes = [8, 1], strides = [1, 1]} : vector<8x12xi32> to vector<8x1xi32>
    %20 = vector.broadcast %19 : vector<8x1xi32> to vector<8x128xi32>
    %21 = arith.cmpi eq, %20, %9 : vector<8x128xi32>
    %22 = arith.extui %21 : vector<8x128xi1> to vector<8x128xi32>
    %23 = arith.sitofp %22 : vector<8x128xi32> to vector<8x128xf32>
    %24 = arith.addf %18, %23 : vector<8x128xf32>
    %25 = vector.extract_strided_slice %4 {offsets = [0, 2], sizes = [8, 1], strides = [1, 1]} : vector<8x12xi32> to vector<8x1xi32>
    %26 = vector.broadcast %25 : vector<8x1xi32> to vector<8x128xi32>
    %27 = arith.cmpi eq, %26, %9 : vector<8x128xi32>
    %28 = arith.extui %27 : vector<8x128xi1> to vector<8x128xi32>
    %29 = arith.sitofp %28 : vector<8x128xi32> to vector<8x128xf32>
    %30 = arith.addf %24, %29 : vector<8x128xf32>
    %31 = vector.extract_strided_slice %4 {offsets = [0, 3], sizes = [8, 1], strides = [1, 1]} : vector<8x12xi32> to vector<8x1xi32>
    %32 = vector.broadcast %31 : vector<8x1xi32> to vector<8x128xi32>
    %33 = arith.cmpi eq, %32, %9 : vector<8x128xi32>
    %34 = arith.extui %33 : vector<8x128xi1> to vector<8x128xi32>
    %35 = arith.sitofp %34 : vector<8x128xi32> to vector<8x128xf32>
    %36 = arith.addf %30, %35 : vector<8x128xf32>
    %37 = vector.extract_strided_slice %4 {offsets = [0, 4], sizes = [8, 1], strides = [1, 1]} : vector<8x12xi32> to vector<8x1xi32>
    %38 = vector.broadcast %37 : vector<8x1xi32> to vector<8x128xi32>
    %39 = arith.cmpi eq, %38, %9 : vector<8x128xi32>
    %40 = arith.extui %39 : vector<8x128xi1> to vector<8x128xi32>
    %41 = arith.sitofp %40 : vector<8x128xi32> to vector<8x128xf32>
    %42 = arith.addf %36, %41 : vector<8x128xf32>
    %43 = vector.extract_strided_slice %4 {offsets = [0, 5], sizes = [8, 1], strides = [1, 1]} : vector<8x12xi32> to vector<8x1xi32>
    %44 = vector.broadcast %43 : vector<8x1xi32> to vector<8x128xi32>
    %45 = arith.cmpi eq, %44, %9 : vector<8x128xi32>
    %46 = arith.extui %45 : vector<8x128xi1> to vector<8x128xi32>
    %47 = arith.sitofp %46 : vector<8x128xi32> to vector<8x128xf32>
    %48 = arith.addf %42, %47 : vector<8x128xf32>
    %49 = vector.extract_strided_slice %4 {offsets = [0, 6], sizes = [8, 1], strides = [1, 1]} : vector<8x12xi32> to vector<8x1xi32>
    %50 = vector.broadcast %49 : vector<8x1xi32> to vector<8x128xi32>
    %51 = arith.cmpi eq, %50, %9 : vector<8x128xi32>
    %52 = arith.extui %51 : vector<8x128xi1> to vector<8x128xi32>
    %53 = arith.sitofp %52 : vector<8x128xi32> to vector<8x128xf32>
    %54 = arith.addf %48, %53 : vector<8x128xf32>
    %55 = vector.extract_strided_slice %4 {offsets = [0, 7], sizes = [8, 1], strides = [1, 1]} : vector<8x12xi32> to vector<8x1xi32>
    %56 = vector.broadcast %55 : vector<8x1xi32> to vector<8x128xi32>
    %57 = arith.cmpi eq, %56, %9 : vector<8x128xi32>
    %58 = arith.extui %57 : vector<8x128xi1> to vector<8x128xi32>
    %59 = arith.sitofp %58 : vector<8x128xi32> to vector<8x128xf32>
    %60 = arith.addf %54, %59 : vector<8x128xf32>
    %61 = vector.extract_strided_slice %4 {offsets = [0, 8], sizes = [8, 1], strides = [1, 1]} : vector<8x12xi32> to vector<8x1xi32>
    %62 = vector.broadcast %61 : vector<8x1xi32> to vector<8x128xi32>
    %63 = arith.cmpi eq, %62, %9 : vector<8x128xi32>
    %64 = arith.extui %63 : vector<8x128xi1> to vector<8x128xi32>
    %65 = arith.sitofp %64 : vector<8x128xi32> to vector<8x128xf32>
    %66 = arith.addf %60, %65 : vector<8x128xf32>
    %67 = vector.extract_strided_slice %4 {offsets = [0, 9], sizes = [8, 1], strides = [1, 1]} : vector<8x12xi32> to vector<8x1xi32>
    %68 = vector.broadcast %67 : vector<8x1xi32> to vector<8x128xi32>
    %69 = arith.cmpi eq, %68, %9 : vector<8x128xi32>
    %70 = arith.extui %69 : vector<8x128xi1> to vector<8x128xi32>
    %71 = arith.sitofp %70 : vector<8x128xi32> to vector<8x128xf32>
    %72 = arith.addf %66, %71 : vector<8x128xf32>
    %73 = vector.extract_strided_slice %4 {offsets = [0, 10], sizes = [8, 1], strides = [1, 1]} : vector<8x12xi32> to vector<8x1xi32>
    %74 = vector.broadcast %73 : vector<8x1xi32> to vector<8x128xi32>
    %75 = arith.cmpi eq, %74, %9 : vector<8x128xi32>
    %76 = arith.extui %75 : vector<8x128xi1> to vector<8x128xi32>
    %77 = arith.sitofp %76 : vector<8x128xi32> to vector<8x128xf32>
    %78 = arith.addf %72, %77 : vector<8x128xf32>
    %79 = vector.extract_strided_slice %4 {offsets = [0, 11], sizes = [8, 1], strides = [1, 1]} : vector<8x12xi32> to vector<8x1xi32>
    %80 = vector.broadcast %79 : vector<8x1xi32> to vector<8x128xi32>
    %81 = arith.cmpi eq, %80, %9 : vector<8x128xi32>
    %82 = arith.extui %81 : vector<8x128xi1> to vector<8x128xi32>
    %83 = arith.sitofp %82 : vector<8x128xi32> to vector<8x128xf32>
    %84 = arith.addf %78, %83 : vector<8x128xf32>
    %c0_9 = arith.constant 0 : index
    %c0_10 = arith.constant 0 : index
    %85 = vector.load %arg8[%c0_9, %c0_10] : memref<8x128xf32, #tpu.memory_space<vmem>>, vector<8x128xf32>
    %cst_11 = arith.constant dense<0.000000e+00> : vector<8x128xf32>
    %86 = tpu.matmul %84, %10, %cst_11 {dimension_numbers = #tpu.dot_dimension_numbers<[1], [0], [0], [1], [0, 0, 1, 1], [], []>} : vector<8x128xf32>, vector<128x128xf32>, vector<8x128xf32> -> vector<8x128xf32>
    %87 = arith.addf %85, %86 : vector<8x128xf32>
    %c0_12 = arith.constant 0 : index
    %c0_13 = arith.constant 0 : index
    %88 = vector.load %arg8[%c0_12, %c0_13] : memref<8x128xf32, #tpu.memory_space<vmem>>, vector<8x128xf32>
    tpu.vector_store %arg8[%c0_12, %c0_13], %87 {strides = array<i32>} : memref<8x128xf32, #tpu.memory_space<vmem>>, vector<8x128xf32>,
    %cst_14 = arith.constant 0.000000e+00 : f32
    %89 = vector.broadcast %cst_14 : f32 to vector<8x128xf32>
    %90 = vector.extract_strided_slice %5 {offsets = [0, 0], sizes = [8, 1], strides = [1, 1]} : vector<8x12xi32> to vector<8x1xi32>
    %91 = vector.broadcast %90 : vector<8x1xi32> to vector<8x128xi32>
    %92 = arith.cmpi eq, %91, %9 : vector<8x128xi32>
    %93 = arith.extui %92 : vector<8x128xi1> to vector<8x128xi32>
    %94 = arith.sitofp %93 : vector<8x128xi32> to vector<8x128xf32>
    %95 = arith.addf %89, %94 : vector<8x128xf32>
    %96 = vector.extract_strided_slice %5 {offsets = [0, 1], sizes = [8, 1], strides = [1, 1]} : vector<8x12xi32> to vector<8x1xi32>
    %97 = vector.broadcast %96 : vector<8x1xi32> to vector<8x128xi32>
    %98 = arith.cmpi eq, %97, %9 : vector<8x128xi32>
    %99 = arith.extui %98 : vector<8x128xi1> to vector<8x128xi32>
    %100 = arith.sitofp %99 : vector<8x128xi32> to vector<8x128xf32>
    %101 = arith.addf %95, %100 : vector<8x128xf32>
    %102 = vector.extract_strided_slice %5 {offsets = [0, 2], sizes = [8, 1], strides = [1, 1]} : vector<8x12xi32> to vector<8x1xi32>
    %103 = vector.broadcast %102 : vector<8x1xi32> to vector<8x128xi32>
    %104 = arith.cmpi eq, %103, %9 : vector<8x128xi32>
    %105 = arith.extui %104 : vector<8x128xi1> to vector<8x128xi32>
    %106 = arith.sitofp %105 : vector<8x128xi32> to vector<8x128xf32>
    %107 = arith.addf %101, %106 : vector<8x128xf32>
    %108 = vector.extract_strided_slice %5 {offsets = [0, 3], sizes = [8, 1], strides = [1, 1]} : vector<8x12xi32> to vector<8x1xi32>
    %109 = vector.broadcast %108 : vector<8x1xi32> to vector<8x128xi32>
    %110 = arith.cmpi eq, %109, %9 : vector<8x128xi32>
    %111 = arith.extui %110 : vector<8x128xi1> to vector<8x128xi32>
    %112 = arith.sitofp %111 : vector<8x128xi32> to vector<8x128xf32>
    %113 = arith.addf %107, %112 : vector<8x128xf32>
    %114 = vector.extract_strided_slice %5 {offsets = [0, 4], sizes = [8, 1], strides = [1, 1]} : vector<8x12xi32> to vector<8x1xi32>
    %115 = vector.broadcast %114 : vector<8x1xi32> to vector<8x128xi32>
    %116 = arith.cmpi eq, %115, %9 : vector<8x128xi32>
    %117 = arith.extui %116 : vector<8x128xi1> to vector<8x128xi32>
    %118 = arith.sitofp %117 : vector<8x128xi32> to vector<8x128xf32>
    %119 = arith.addf %113, %118 : vector<8x128xf32>
    %120 = vector.extract_strided_slice %5 {offsets = [0, 5], sizes = [8, 1], strides = [1, 1]} : vector<8x12xi32> to vector<8x1xi32>
    %121 = vector.broadcast %120 : vector<8x1xi32> to vector<8x128xi32>
    %122 = arith.cmpi eq, %121, %9 : vector<8x128xi32>
    %123 = arith.extui %122 : vector<8x128xi1> to vector<8x128xi32>
    %124 = arith.sitofp %123 : vector<8x128xi32> to vector<8x128xf32>
    %125 = arith.addf %119, %124 : vector<8x128xf32>
    %126 = vector.extract_strided_slice %5 {offsets = [0, 6], sizes = [8, 1], strides = [1, 1]} : vector<8x12xi32> to vector<8x1xi32>
    %127 = vector.broadcast %126 : vector<8x1xi32> to vector<8x128xi32>
    %128 = arith.cmpi eq, %127, %9 : vector<8x128xi32>
    %129 = arith.extui %128 : vector<8x128xi1> to vector<8x128xi32>
    %130 = arith.sitofp %129 : vector<8x128xi32> to vector<8x128xf32>
    %131 = arith.addf %125, %130 : vector<8x128xf32>
    %132 = vector.extract_strided_slice %5 {offsets = [0, 7], sizes = [8, 1], strides = [1, 1]} : vector<8x12xi32> to vector<8x1xi32>
    %133 = vector.broadcast %132 : vector<8x1xi32> to vector<8x128xi32>
    %134 = arith.cmpi eq, %133, %9 : vector<8x128xi32>
    %135 = arith.extui %134 : vector<8x128xi1> to vector<8x128xi32>
    %136 = arith.sitofp %135 : vector<8x128xi32> to vector<8x128xf32>
    %137 = arith.addf %131, %136 : vector<8x128xf32>
    %138 = vector.extract_strided_slice %5 {offsets = [0, 8], sizes = [8, 1], strides = [1, 1]} : vector<8x12xi32> to vector<8x1xi32>
    %139 = vector.broadcast %138 : vector<8x1xi32> to vector<8x128xi32>
    %140 = arith.cmpi eq, %139, %9 : vector<8x128xi32>
    %141 = arith.extui %140 : vector<8x128xi1> to vector<8x128xi32>
    %142 = arith.sitofp %141 : vector<8x128xi32> to vector<8x128xf32>
    %143 = arith.addf %137, %142 : vector<8x128xf32>
    %144 = vector.extract_strided_slice %5 {offsets = [0, 9], sizes = [8, 1], strides = [1, 1]} : vector<8x12xi32> to vector<8x1xi32>
    %145 = vector.broadcast %144 : vector<8x1xi32> to vector<8x128xi32>
    %146 = arith.cmpi eq, %145, %9 : vector<8x128xi32>
    %147 = arith.extui %146 : vector<8x128xi1> to vector<8x128xi32>
    %148 = arith.sitofp %147 : vector<8x128xi32> to vector<8x128xf32>
    %149 = arith.addf %143, %148 : vector<8x128xf32>
    %150 = vector.extract_strided_slice %5 {offsets = [0, 10], sizes = [8, 1], strides = [1, 1]} : vector<8x12xi32> to vector<8x1xi32>
    %151 = vector.broadcast %150 : vector<8x1xi32> to vector<8x128xi32>
    %152 = arith.cmpi eq, %151, %9 : vector<8x128xi32>
    %153 = arith.extui %152 : vector<8x128xi1> to vector<8x128xi32>
    %154 = arith.sitofp %153 : vector<8x128xi32> to vector<8x128xf32>
    %155 = arith.addf %149, %154 : vector<8x128xf32>
    %156 = vector.extract_strided_slice %5 {offsets = [0, 11], sizes = [8, 1], strides = [1, 1]} : vector<8x12xi32> to vector<8x1xi32>
    %157 = vector.broadcast %156 : vector<8x1xi32> to vector<8x128xi32>
    %158 = arith.cmpi eq, %157, %9 : vector<8x128xi32>
    %159 = arith.extui %158 : vector<8x128xi1> to vector<8x128xi32>
    %160 = arith.sitofp %159 : vector<8x128xi32> to vector<8x128xf32>
    %161 = arith.addf %155, %160 : vector<8x128xf32>
    %c0_15 = arith.constant 0 : index
    %c0_16 = arith.constant 0 : index
    %162 = vector.load %arg8[%c0_15, %c0_16] : memref<8x128xf32, #tpu.memory_space<vmem>>, vector<8x128xf32>
    %cst_17 = arith.constant dense<0.000000e+00> : vector<8x128xf32>
    %163 = tpu.matmul %161, %11, %cst_17 {dimension_numbers = #tpu.dot_dimension_numbers<[1], [0], [0], [1], [0, 0, 1, 1], [], []>} : vector<8x128xf32>, vector<128x128xf32>, vector<8x128xf32> -> vector<8x128xf32>
    %164 = arith.addf %162, %163 : vector<8x128xf32>
    %c0_18 = arith.constant 0 : index
    %c0_19 = arith.constant 0 : index
    %165 = vector.load %arg8[%c0_18, %c0_19] : memref<8x128xf32, #tpu.memory_space<vmem>>, vector<8x128xf32>
    tpu.vector_store %arg8[%c0_18, %c0_19], %164 {strides = array<i32>} : memref<8x128xf32, #tpu.memory_space<vmem>>, vector<8x128xf32>,
    %c0_i32_20 = arith.constant 0 : i32
    %166 = arith.cmpi eq, %arg1, %c0_i32_20 : i32
    %167 = arith.extui %166 : i1 to i32
    %c0_i32_21 = arith.constant 0 : i32
    %168 = arith.cmpi ne, %167, %c0_i32_21 : i32
    scf.if %168 {
      %c0_22 = arith.constant 0 : index
      %c0_23 = arith.constant 0 : index
      %169 = vector.load %arg8[%c0_22, %c0_23] : memref<8x128xf32, #tpu.memory_space<vmem>>, vector<8x128xf32>
      %c0_24 = arith.constant 0 : index
      %c0_25 = arith.constant 0 : index
      %170 = vector.load %arg6[%c0_24, %c0_25] : memref<1x128xf32, #tpu.memory_space<vmem>>, vector<1x128xf32>
      %171 = vector.broadcast %170 : vector<1x128xf32> to vector<8x128xf32>
      %172 = arith.addf %169, %171 : vector<8x128xf32>
      %c0_26 = arith.constant 0 : index
      %c0_27 = arith.constant 0 : index
      %173 = vector.load %arg7[%c0_26, %c0_27] : memref<8x128xf32, #tpu.memory_space<vmem>>, vector<8x128xf32>
      tpu.vector_store %arg7[%c0_26, %c0_27], %172 {strides = array<i32>} : memref<8x128xf32, #tpu.memory_space<vmem>>, vector<8x128xf32>,
    } else {
    }
    return
  }
  func.func @transform_0(%arg0: i32, %arg1: i32) -> (i32, i32) {
    %c0_i32 = arith.constant 0 : i32
    %c0_i32_0 = arith.constant 0 : i32
    return %arg0, %c0_i32 : i32, i32
  }
  func.func @transform_1(%arg0: i32, %arg1: i32) -> (i32, i32) {
    %c0_i32 = arith.constant 0 : i32
    %c0_i32_0 = arith.constant 0 : i32
    return %arg0, %c0_i32 : i32, i32
  }
  func.func @transform_2(%arg0: i32, %arg1: i32) -> (i32, i32) {
    %c0_i32 = arith.constant 0 : i32
    %c0_i32_0 = arith.constant 0 : i32
    return %arg1, %c0_i32 : i32, i32
  }
  func.func @transform_3(%arg0: i32, %arg1: i32) -> (i32, i32) {
    %c0_i32 = arith.constant 0 : i32
    %c0_i32_0 = arith.constant 0 : i32
    return %arg1, %c0_i32 : i32, i32
  }
  func.func @transform_4(%arg0: i32, %arg1: i32) -> (i32, i32) {
    %c0_i32 = arith.constant 0 : i32
    %c0_i32_0 = arith.constant 0 : i32
    %c0_i32_1 = arith.constant 0 : i32
    return %c0_i32, %c0_i32_0 : i32, i32
  }
  func.func @transform_5(%arg0: i32, %arg1: i32) -> (i32, i32) {
    %c0_i32 = arith.constant 0 : i32
    %c0_i32_0 = arith.constant 0 : i32
    return %arg0, %c0_i32 : i32, i32
  }
}

</mosaic_0001>

<bundles_post_ra>
// kernel: tpu_custom_call.1
= control target key start
LH: loop header
LB: loop body
LE: loop exit
PB: predicated region body
PF: predicated region fallthrough
CT: control target
= control target key end

     0   :  { %10 = vsyncpa [#allocation4], 0  ;;  %s1013_s0 = inlined_call_operand.hbm [shape: s32[8,12], index: 0, kind: input, shape index: {}]   ;;  %s1014_s1 = inlined_call_operand.hbm [shape: s32[8,12], index: 1, kind: input, shape index: {}]   ;;  %s1015_s2 = inlined_call_operand.hbm [shape: f32[128,128], index: 2, kind: input, shape index: {}]   ;;  %s1016_s3 = inlined_call_operand.hbm [shape: f32[128,128], index: 3, kind: input, shape index: {}]   ;;  %s1017_s4 = inlined_call_operand.vmem [shape: f32[1,128], index: 4, kind: input, shape index: {}]   ;;  %s1018_s5 = inlined_call_operand.hbm [shape: f32[8,128], index: 5, kind: output, shape index: {}]  }
   0x1   :  { %11 = vsyncpa [#allocation7], 0 }
   0x2   :  { %12 = vsyncpa [#allocation10], 0 }
   0x3   :  { %13 = vsyncpa [#allocation5], 0  ;;  %s798_s18 = smov [#allocation6]   ;;  %s799_s20 = smov [#allocation3]  }
   0x4   :  { %s30_s19 = sshll.u32 %s798_s18, 4  ;;  %s20_s21 = sshll.u32 %s799_s20, 4  ;;  %s31_s19 = int_to_ptr.vmem [resolvable:$true] %s30_s19  ;;  %s21_s21 = int_to_ptr.vmem [resolvable:$true] %s20_s21 }
   0x5   :  { %s680_s24 = scalar_lea.hbm %s1014_s1, 128 }
   0x6   :  { %p681_p0 = scmp.ne.s32.totalorder %s1014_s1, %s680_s24  ;;  %p684_p1 = scmp.lt.u32.totalorder %s680_s24, %s1014_s1 }
   0x8   :  { %p686_p2 = pnand %p684_p1, %p681_p0 }
   0xa   :  { %689 = shalt.err (!%p686_p2)
}
   0xb   :  { %s690_s29 = scalar_lea.vmem %s31_s19, 128  ;;  %p695_p4 = scmp.lt.s32.totalorder %s31_s19, %s31_s19 }
   0xc   :  { %p691_p3 = scmp.ne.s32.totalorder %s31_s19, %s690_s29  ;;  %p696_p5 = scmp.lt.s32.totalorder %s690_s29, %s690_s29 }
   0xe   :  { %p697_p6 = por %p696_p5, %p695_p4 }
  0x10   :  { %p698_p7 = pnand %p697_p6, %p691_p3 }
  0x12   :  { %701 = shalt.err (!%p698_p7)
}
  0x13   :  { %33 = dma.hbm_to_vmem [thread:$0]  %s1014_s1, 128, %s31_s19, [#allocation7]  }
  0x14   :  { %s702_s9 = scalar_lea.hbm %s1013_s0, 128 }
  0x15   :  { %p703_p8 = scmp.ne.s32.totalorder %s1013_s0, %s702_s9  ;;  %p706_p9 = scmp.lt.u32.totalorder %s702_s9, %s1013_s0 }
  0x17   :  { %p708_p10 = pnand %p706_p9, %p703_p8 }
  0x19   :  { %711 = shalt.err (!%p708_p10)
}
  0x1a   :  { %s712_s14 = scalar_lea.vmem %s21_s21, 128  ;;  %p717_p12 = scmp.lt.s32.totalorder %s21_s21, %s21_s21 }
  0x1b   :  { %p713_p11 = scmp.ne.s32.totalorder %s21_s21, %s712_s14  ;;  %p718_p13 = scmp.lt.s32.totalorder %s712_s14, %s712_s14 }
  0x1d   :  { %p719_p0 = por %p718_p13, %p717_p12 }
  0x1f   :  { %p720_p1 = pnand %p719_p0, %p713_p11 }
  0x21   :  { %723 = shalt.err (!%p720_p1)
}
  0x22   :  { %23 = dma.hbm_to_vmem [thread:$0]  %s1013_s0, 128, %s21_s21, [#allocation4]  }
  0x23   :  { %s800_s16 = smov [#allocation8]   ;;  %s724_s20 = scalar_lea.hbm %s1015_s2, 2048 }
  0x24   :  { %s39_s17 = sshll.u32 %s800_s16, 4  ;;  %p725_p2 = scmp.ne.s32.totalorder %s1015_s2, %s724_s20  ;;  %s40_s17 = int_to_ptr.vmem [resolvable:$true] %s39_s17 }
  0x25   :  { %p728_p3 = scmp.lt.u32.totalorder %s724_s20, %s1015_s2 }
  0x27   :  { %p730_p4 = pnand %p728_p3, %p725_p2 }
  0x29   :  { %733 = shalt.err (!%p730_p4)
}
  0x2a   :  { %s734_s26 = scalar_lea.vmem %s40_s17, 2048  ;;  %p739_p6 = scmp.lt.s32.totalorder %s40_s17, %s40_s17 }
  0x2b   :  { %p735_p5 = scmp.ne.s32.totalorder %s40_s17, %s734_s26  ;;  %p740_p7 = scmp.lt.s32.totalorder %s734_s26, %s734_s26 }
  0x2d   :  { %p741_p8 = por %p740_p7, %p739_p6 }
  0x2f   :  { %p742_p9 = pnand %p741_p8, %p735_p5 }
  0x31   :  { %745 = shalt.err (!%p742_p9)
}
  0x32   :  { %s801_s0 = smov 128   ;;  %s802_s21 = smov 8  }
  0x33   :  { %45 = dma.hbm_to_vmem [thread:$0]  %s1015_s2, 2048, %s40_s17, [#allocation7], %s801_s0, %s801_s0, %s802_s21  }
  0x34   :  { %s803_s29 = smov [#allocation9]   ;;  %s746_s8 = scalar_lea.hbm %s1016_s3, 2048 }
  0x35   :  { %s51_s30 = sshll.u32 %s803_s29, 4  ;;  %p747_p10 = scmp.ne.s32.totalorder %s1016_s3, %s746_s8  ;;  %s52_s30 = int_to_ptr.vmem [resolvable:$true] %s51_s30 }
  0x36   :  { %p750_p11 = scmp.lt.u32.totalorder %s746_s8, %s1016_s3 }
  0x38   :  { %p752_p12 = pnand %p750_p11, %p747_p10 }
  0x3a   :  { %755 = shalt.err (!%p752_p12)
}
  0x3b   :  { %s756_s13 = scalar_lea.vmem %s52_s30, 2048  ;;  %p761_p0 = scmp.lt.s32.totalorder %s52_s30, %s52_s30 }
  0x3c   :  { %p757_p13 = scmp.ne.s32.totalorder %s52_s30, %s756_s13  ;;  %p762_p1 = scmp.lt.s32.totalorder %s756_s13, %s756_s13 }
  0x3e   :  { %p763_p2 = por %p762_p1, %p761_p0 }
  0x40   :  { %p764_p3 = pnand %p763_p2, %p757_p13 }
  0x42   :  { %767 = shalt.err (!%p764_p3)
}
  0x43   :  { %57 = dma.hbm_to_vmem [thread:$0]  %s1016_s3, 2048, %s52_s30, [#allocation10], %s801_s0, %s801_s0, %s802_s21  }
  0x44   :  { %790 = dma.done.wait [#allocation4], 128  }
  0x45   :  { %791 = vsyncadd [#allocation4], 4294967168 }
  0x46   :  { %792 = dma.done.wait [#allocation7], 2176  }
  0x47   :  { %793 = vsyncadd [#allocation7], 4294965120 }
  0x48   :  { %794 = dma.done.wait [#allocation10], 2048  }
  0x49   :  { %795 = vsyncadd [#allocation10], 4294965248  ;;  %v804_v0 = vmov 0   ;;  %v898_v1 = vld [vmem:[#allocation6] sm:$0xff]  ;;  %v900_v2 = vld [vmem:[#allocation3] sm:$0xff]  ;;  %v805_v3 = vmov 1  }
  0x4a   :  { %661 = vset.pattern.permute.xlu1 %v804_v0  ;;  %659 = vset.pattern.permute.xlu0 %v804_v0  ;;  %v806_v4 = vmov 2   ;;  %v807_v5 = vmov 3   ;;  %v808_v6 = vmov 4   ;;  %v809_v7 = vmov 5   ;;  %v100_v12 = vld [vmem:[#allocation9] sm:$0xff]  ;;  %v101_v13 = vld [vmem:[#allocation9 + $0x8] sm:$0xff] }
  0x4b   :  { %274 = vperm.xlu1 %661, %v898_v1   ;;  %117 = vperm.xlu0 %659, %v900_v2   ;;  %v810_v8 = vmov 7   ;;  %v811_v9 = vmov 8   ;;  %v812_v10 = vmov 6   ;;  %v813_v11 = vmov 10   ;;  %v84_v16 = vld [vmem:[#allocation8] sm:$0xff]  ;;  %v85_v17 = vld [vmem:[#allocation8 + $0x8] sm:$0xff] }
  0x4c   :  { %v614_v14 = vpack.c.bf16 %v101_v13, %v100_v12  ;;  %v814_v15 = vmov 0.0|0.0   ;;  %v590_v18 = vpack.c.bf16 %v85_v17, %v84_v16  ;;  %v102_v19 = vld [vmem:[#allocation9 + $0x10] sm:$0xff]  ;;  %v103_v20 = vld [vmem:[#allocation9 + $0x18] sm:$0xff]  ;;  %v815_v21 = vmov 11   ;;  %v104_v26 = vld [vmem:[#allocation9 + $0x20] sm:$0xff]  ;;  %s819_s15 = smov [#allocation11]  }
  0x4d   :  { %613 = vmatprep.subr.bf16.mxu1 %v814_v15  ;;  %589 = vmatprep.subr.bf16.mxu0 %v814_v15  ;;  %v617_v22 = vpack.c.bf16 %v103_v20, %v102_v19  ;;  %v86_v23 = vld [vmem:[#allocation8 + $0x10] sm:$0xff]  ;;  %v87_v24 = vld [vmem:[#allocation8 + $0x18] sm:$0xff]  ;;  %v105_v27 = vld [vmem:[#allocation9 + $0x28] sm:$0xff]  ;;  %v816_v41 = vmov 9   ;;  %vm817_vm0 = vmmov 0   ;;  %v818_v63 = vmov 0.0  }
  0x4e   :  { %615 = vmatpush3.bf16.msra.mxu1 %v614_v14  ;;  %591 = vmatpush3.bf16.msra.mxu0 %v590_v18  ;;  %v593_v25 = vpack.c.bf16 %v87_v24, %v86_v23  ;;  %v620_v28 = vpack.c.bf16 %v105_v27, %v104_v26  ;;  %v88_v29 = vld [vmem:[#allocation8 + $0x20] sm:$0xff]  ;;  %v89_v30 = vld [vmem:[#allocation8 + $0x28] sm:$0xff]  ;;  %v106_v32 = vld [vmem:[#allocation9 + $0x30] sm:$0xff]  ;;  %s449_s16 = sshll.u32 %s819_s15, 4  ;;  %s450_s16 = int_to_ptr.vmem [resolvable:$true] %s449_s16 }
  0x4f   :  { %662 = vset.pattern.permute.xlu1 %v805_v3  ;;  %660 = vset.pattern.permute.xlu0 %v805_v3  ;;  %v596_v31 = vpack.c.bf16 %v89_v30, %v88_v29  ;;  %v107_v33 = vld [vmem:[#allocation9 + $0x38] sm:$0xff]  ;;  %v90_v35 = vld [vmem:[#allocation8 + $0x30] sm:$0xff]  ;;  %v108_v38 = vld [vmem:[#allocation9 + $0x40] sm:$0xff]  ;;  %s768_s17 = scalar_lea.vmem %s450_s16, 128  ;;  %p773_p5 = scmp.lt.s32.totalorder %s450_s16, %s450_s16 }
  0x50   :  { %281 = vperm.xlu1 %662, %v898_v1   ;;  %124 = vperm.xlu0 %660, %v900_v2   ;;  %v623_v34 = vpack.c.bf16 %v107_v33, %v106_v32  ;;  %v91_v36 = vld [vmem:[#allocation8 + $0x38] sm:$0xff]  ;;  %v109_v39 = vld [vmem:[#allocation9 + $0x48] sm:$0xff]  ;;  %v92_v42 = vld [vmem:[#allocation8 + $0x40] sm:$0xff]  ;;  %p769_p4 = scmp.ne.s32.totalorder %s450_s16, %s768_s17  ;;  %p774_p6 = scmp.lt.s32.totalorder %s768_s17, %s768_s17 }
  0x51   :  { %616 = vmatprep.subr.bf16.mxu1 %v814_v15  ;;  %592 = vmatprep.subr.bf16.mxu0 %v814_v15  ;;  %v599_v37 = vpack.c.bf16 %v91_v36, %v90_v35  ;;  %v626_v40 = vpack.c.bf16 %v109_v39, %v108_v38  ;;  %v93_v43 = vld [vmem:[#allocation8 + $0x48] sm:$0xff]  ;;  %v110_v45 = vld [vmem:[#allocation9 + $0x50] sm:$0xff]  ;;  %v111_v46 = vld [vmem:[#allocation9 + $0x58] sm:$0xff] }
  0x52   :  { %618 = vmatpush3.bf16.msra.mxu1 %v617_v22  ;;  %594 = vmatpush3.bf16.msra.mxu0 %v593_v25  ;;  %v602_v44 = vpack.c.bf16 %v93_v43, %v92_v42  ;;  %v629_v47 = vpack.c.bf16 %v111_v46, %v110_v45  ;;  %v94_v48 = vld [vmem:[#allocation8 + $0x50] sm:$0xff]  ;;  %v95_v49 = vld [vmem:[#allocation8 + $0x58] sm:$0xff]  ;;  %v112_v51 = vld [vmem:[#allocation9 + $0x60] sm:$0xff]  ;;  %p775_p7 = por %p774_p6, %p773_p5 }
  0x53   :  { %619 = vmatprep.subr.bf16.mxu1 %v814_v15  ;;  %595 = vmatprep.subr.bf16.mxu0 %v814_v15  ;;  %v605_v50 = vpack.c.bf16 %v95_v49, %v94_v48  ;;  %v113_v52 = vld [vmem:[#allocation9 + $0x68] sm:$0xff]  ;;  %v96_v54 = vld [vmem:[#allocation8 + $0x60] sm:$0xff]  ;;  %v114_v57 = vld [vmem:[#allocation9 + $0x70] sm:$0xff] }
  0x54   :  { %663 = vset.pattern.permute.xlu1 %v806_v4  ;;  %664 = vset.pattern.permute.xlu0 %v806_v4  ;;  %v632_v53 = vpack.c.bf16 %v113_v52, %v112_v51  ;;  %v97_v55 = vld [vmem:[#allocation8 + $0x68] sm:$0xff]  ;;  %v115_v58 = vld [vmem:[#allocation9 + $0x78] sm:$0xff]  ;;  %v98_v60 = vld [vmem:[#allocation8 + $0x70] sm:$0xff]  ;;  %p776_p8 = pnand %p775_p7, %p769_p4 }
  0x55   :  { %131 = vperm.xlu1 %663, %v900_v2   ;;  %288 = vperm.xlu0 %664, %v898_v1   ;;  %v608_v56 = vpack.c.bf16 %v97_v55, %v96_v54  ;;  %v635_v59 = vpack.c.bf16 %v115_v58, %v114_v57  ;;  %v99_v61 = vld [vmem:[#allocation8 + $0x78] sm:$0xff] }
  0x56   :  { %621 = vmatpush3.bf16.msra.mxu1 %v620_v28  ;;  %597 = vmatpush3.bf16.msra.mxu0 %v596_v31  ;;  %v611_v62 = vpack.c.bf16 %v99_v61, %v98_v60 }
  0x57   :  { %622 = vmatprep.subr.bf16.mxu1 %v814_v15  ;;  %598 = vmatprep.subr.bf16.mxu0 %v814_v15 }
  0x58   :  { %586 = vmatprep.mubr.msk.f32.mxu1 %vm817_vm0, %v818_v63  ;;  %551 = vmatprep.mubr.msk.f32.mxu0 %vm817_vm0, %v818_v63 }
  0x59   :  { %665 = vset.pattern.permute.xlu1 %v807_v5  ;;  %666 = vset.pattern.permute.xlu0 %v808_v6 }
  0x5a   :  { %138 = vperm.xlu1 %665, %v900_v2   ;;  %145 = vperm.xlu0 %666, %v900_v2  }
  0x5b   :  { %624 = vmatpush3.bf16.msra.mxu1 %v623_v34  ;;  %600 = vmatpush3.bf16.msra.mxu0 %v599_v37 }
  0x5c   :  { %625 = vmatprep.subr.bf16.mxu1 %v814_v15  ;;  %601 = vmatprep.subr.bf16.mxu0 %v814_v15 }
  0x5e   :  { %295 = vperm.xlu1 %665, %v898_v1   ;;  %669 = vset.pattern.permute.xlu0 %v809_v7 }
  0x5f   :  { %309 = vperm.xlu0 %669, %v898_v1   ;;  %627 = vmatpush3.bf16.msra.mxu1 %v626_v40 }
  0x60   :  { %628 = vmatprep.subr.bf16.mxu1 %v814_v15  ;;  %603 = vmatpush3.bf16.msra.mxu0 %v602_v44 }
  0x61   :  { %604 = vmatprep.subr.bf16.mxu0 %v814_v15 }
  0x62   :  { %667 = vset.pattern.permute.xlu1 %v808_v6 }
  0x63   :  { %302 = vperm.xlu1 %667, %v898_v1   ;;  %671 = vset.pattern.permute.xlu0 %v810_v8 }
  0x64   :  { %166 = vperm.xlu0 %671, %v900_v2   ;;  %630 = vmatpush3.bf16.msra.mxu1 %v629_v47 }
  0x65   :  { %631 = vmatprep.subr.bf16.mxu1 %v814_v15  ;;  %606 = vmatpush3.bf16.msra.mxu0 %v605_v50 }
  0x66   :  { %607 = vmatprep.subr.bf16.mxu0 %v814_v15 }
  0x67   :  { %668 = vset.pattern.permute.xlu1 %v809_v7 }
  0x68   :  { %152 = vperm.xlu1 %668, %v900_v2   ;;  %674 = vset.pattern.permute.xlu0 %v811_v9 }
  0x69   :  { %330 = vperm.xlu0 %674, %v898_v1   ;;  %633 = vmatpush3.bf16.msra.mxu1 %v632_v53 }
  0x6a   :  { %634 = vmatprep.subr.bf16.mxu1 %v814_v15  ;;  %609 = vmatpush3.bf16.msra.mxu0 %v608_v56 }
  0x6b   :  { %610 = vmatprep.subr.bf16.mxu0 %v814_v15 }
  0x6c   :  { %670 = vset.pattern.permute.xlu1 %v812_v10  ;;  %v80_v10 = vlaneseq }
  0x6d   :  { %159 = vperm.xlu1 %670, %v900_v2   ;;  %676 = vset.pattern.permute.xlu0 %v813_v11 }
  0x6e   :  { %187 = vperm.xlu0 %676, %v900_v2   ;;  %636 = vmatpush3.bf16.msra.mxu1 %v635_v59 }
  0x6f   :  { %612 = vmatpush3.bf16.msra.mxu0 %v611_v62 }
  0x71   :  { %316 = vperm.xlu1 %670, %v898_v1  }
  0x72   :  { %679 = vset.pattern.permute.xlu0 %v815_v21 }
  0x73   :  { %351 = vperm.xlu0 %679, %v898_v1  }
  0x75   :  { %672 = vset.pattern.permute.xlu1 %v810_v8 }
  0x76   :  { %323 = vperm.xlu1 %672, %v898_v1  }
  0x7a   :  { %673 = vset.pattern.permute.xlu1 %v811_v9 }
  0x7b   :  { %173 = vperm.xlu1 %673, %v900_v2  }
  0x7f   :  { %675 = vset.pattern.permute.xlu1 %v816_v41 }
  0x80   :  { %180 = vperm.xlu1 %675, %v900_v2  }
  0x84   :  { %337 = vperm.xlu1 %675, %v898_v1  }
  0x88   :  { %677 = vset.pattern.permute.xlu1 %v813_v11  ;;  %v948_v11 = vand.u32 127, %v80_v10 }
  0x89   :  { %344 = vperm.xlu1 %677, %v898_v1  }
  0x8d   :  { %678 = vset.pattern.permute.xlu1 %v815_v21 }
  0x8e   :  { %194 = vperm.xlu1 %678, %v900_v2  }
  0xca   :  { %v275_v0 = vpop.permute.xlu1 %274  ;;  %v118_v6 = vpop.permute.xlu0 %117 }
  0xcb   :  { %vm119_vm1 = vcmp.eq.s32.totalorder %v118_v6, %v948_v11  ;;  %vm276_vm4 = vcmp.eq.s32.totalorder %v275_v0, %v948_v11 }
  0xcc   :  { %v460_v15 = vsel %vm119_vm1, 1.0, %v818_v63  ;;  %v472_v18 = vsel %vm276_vm4, 1.0, %v818_v63 }
  0xcf   :  { %v282_v1 = vpop.permute.xlu1 %281  ;;  %v125_v8 = vpop.permute.xlu0 %124 }
  0xd0   :  { %vm126_vm2 = vcmp.eq.s32.totalorder %v125_v8, %v948_v11  ;;  %vm283_vm3 = vcmp.eq.s32.totalorder %v282_v1, %v948_v11 }
  0xd1   :  { %v461_v16 = vsel %vm126_vm2, 1.0, %v818_v63  ;;  %v473_v17 = vsel %vm283_vm3, 1.0, %v818_v63 }
  0xd2   :  { %v129_v19 = vadd.f32 %v461_v16, %v460_v15  ;;  %v286_v22 = vadd.f32 %v473_v17, %v472_v18 }
  0xd4   :  { %v132_v3 = vpop.permute.xlu1 %131  ;;  %v289_v2 = vpop.permute.xlu0 %288 }
  0xd5   :  { %vm290_vm5 = vcmp.eq.s32.totalorder %v289_v2, %v948_v11  ;;  %vm133_vm6 = vcmp.eq.s32.totalorder %v132_v3, %v948_v11 }
  0xd6   :  { %v474_v20 = vsel %vm290_vm5, 1.0, %v818_v63  ;;  %v462_v23 = vsel %vm133_vm6, 1.0, %v818_v63 }
  0xd7   :  { %v293_v26 = vadd.f32 %v474_v20, %v286_v22  ;;  %v136_v28 = vadd.f32 %v462_v23, %v129_v19 }
  0xd9   :  { %v139_v4 = vpop.permute.xlu1 %138  ;;  %v146_v13 = vpop.permute.xlu0 %145 }
  0xda   :  { %vm140_vm8 = vcmp.eq.s32.totalorder %v139_v4, %v948_v11  ;;  %vm147_vm10 = vcmp.eq.s32.totalorder %v146_v13, %v948_v11  ;;  %v484_v13 = vld [vmem:[%s1017_s4] ss:$0 sm:$0xff] }
  0xdb   :  { %v463_v27 = vsel %vm140_vm8, 1.0, %v818_v63  ;;  %v464_v34 = vsel %vm147_vm10, 1.0, %v818_v63 }
  0xdc   :  { %v143_v32 = vadd.f32 %v463_v27, %v136_v28 }
  0xdd   :  { %v296_v5 = vpop.permute.xlu1 %295 }
  0xde   :  { %vm297_vm7 = vcmp.eq.s32.totalorder %v296_v5, %v948_v11  ;;  %v310_v21 = vpop.permute.xlu0 %309  ;;  %v150_v39 = vadd.f32 %v464_v34, %v143_v32 }
  0xdf   :  { %v475_v25 = vsel %vm297_vm7, 1.0, %v818_v63  ;;  %vm311_vm11 = vcmp.eq.s32.totalorder %v310_v21, %v948_v11 }
  0xe0   :  { %v300_v31 = vadd.f32 %v475_v25, %v293_v26  ;;  %v477_v36 = vsel %vm311_vm11, 1.0, %v818_v63 }
  0xe2   :  { %v303_v7 = vpop.permute.xlu1 %302 }
  0xe3   :  { %vm304_vm9 = vcmp.eq.s32.totalorder %v303_v7, %v948_v11  ;;  %v167_v30 = vpop.permute.xlu0 %166 }
  0xe4   :  { %v476_v29 = vsel %vm304_vm9, 1.0, %v818_v63  ;;  %vm168_vm0 = vcmp.eq.s32.totalorder %v167_v30, %v948_v11 }
  0xe5   :  { %v307_v35 = vadd.f32 %v476_v29, %v300_v31  ;;  %v467_v49 = vsel %vm168_vm0, 1.0, %v818_v63 }
  0xe7   :  { %v153_v9 = vpop.permute.xlu1 %152  ;;  %v314_v41 = vadd.f32 %v477_v36, %v307_v35 }
  0xe8   :  { %vm154_vm12 = vcmp.eq.s32.totalorder %v153_v9, %v948_v11  ;;  %v331_v37 = vpop.permute.xlu0 %330 }
  0xe9   :  { %v465_v38 = vsel %vm154_vm12, 1.0, %v818_v63  ;;  %vm332_vm1 = vcmp.eq.s32.totalorder %v331_v37, %v948_v11 }
  0xea   :  { %v157_v44 = vadd.f32 %v465_v38, %v150_v39  ;;  %v480_v52 = vsel %vm332_vm1, 1.0, %v818_v63 }
  0xec   :  { %v160_v12 = vpop.permute.xlu1 %159 }
  0xed   :  { %vm161_vm14 = vcmp.eq.s32.totalorder %v160_v12, %v948_v11  ;;  %v188_v46 = vpop.permute.xlu0 %187 }
  0xee   :  { %v466_v42 = vsel %vm161_vm14, 1.0, %v818_v63  ;;  %vm189_vm6 = vcmp.eq.s32.totalorder %v188_v46, %v948_v11 }
  0xef   :  { %v164_v48 = vadd.f32 %v466_v42, %v157_v44  ;;  %v470_v3 = vsel %vm189_vm6, 1.0, %v818_v63 }
  0xf0   :  { %v317_v14 = vpop.permute.xlu1 %316 }
  0xf1   :  { %vm318_vm13 = vcmp.eq.s32.totalorder %v317_v14, %v948_v11  ;;  %v171_v55 = vadd.f32 %v467_v49, %v164_v48 }
  0xf2   :  { %v478_v40 = vsel %vm318_vm13, 1.0, %v818_v63  ;;  %v352_v53 = vpop.permute.xlu0 %351 }
  0xf3   :  { %v321_v47 = vadd.f32 %v478_v40, %v314_v41  ;;  %vm353_vm5 = vcmp.eq.s32.totalorder %v352_v53, %v948_v11 }
  0xf4   :  { %v483_v1 = vsel %vm353_vm5, 1.0, %v818_v63 }
  0xf5   :  { %v324_v24 = vpop.permute.xlu1 %323 }
  0xf6   :  { %vm325_vm15 = vcmp.eq.s32.totalorder %v324_v24, %v948_v11 }
  0xf7   :  { %v479_v45 = vsel %vm325_vm15, 1.0, %v818_v63 }
  0xf8   :  { %v328_v50 = vadd.f32 %v479_v45, %v321_v47 }
  0xfa   :  { %v174_v33 = vpop.permute.xlu1 %173  ;;  %v335_v57 = vadd.f32 %v480_v52, %v328_v50 }
  0xfb   :  { %vm175_vm2 = vcmp.eq.s32.totalorder %v174_v33, %v948_v11 }
  0xfc   :  { %v468_v54 = vsel %vm175_vm2, 1.0, %v818_v63 }
  0xfd   :  { %v178_v59 = vadd.f32 %v468_v54, %v171_v55 }
  0xff   :  { %v181_v43 = vpop.permute.xlu1 %180 }
 0x100   :  { %vm182_vm3 = vcmp.eq.s32.totalorder %v181_v43, %v948_v11 }
 0x101   :  { %v469_v58 = vsel %vm182_vm3, 1.0, %v818_v63 }
 0x102   :  { %v185_v62 = vadd.f32 %v469_v58, %v178_v59 }
 0x103   :  { %v338_v51 = vpop.permute.xlu1 %337 }
 0x104   :  { %vm339_vm4 = vcmp.eq.s32.totalorder %v338_v51, %v948_v11  ;;  %v192_v7 = vadd.f32 %v470_v3, %v185_v62 }
 0x105   :  { %v481_v56 = vsel %vm339_vm4, 1.0, %v818_v63 }
 0x106   :  { %v342_v61 = vadd.f32 %v481_v56, %v335_v57 }
 0x108   :  { %v345_v60 = vpop.permute.xlu1 %344 }
 0x109   :  { %vm346_vm7 = vcmp.eq.s32.totalorder %v345_v60, %v948_v11 }
 0x10a   :  { %v482_v0 = vsel %vm346_vm7, 1.0, %v818_v63 }
 0x10b   :  { %v349_v4 = vadd.f32 %v482_v0, %v342_v61 }
 0x10d   :  { %v356_v5 = vadd.f32 %v483_v1, %v349_v4  ;;  %v195_v6 = vpop.permute.xlu1 %194 }
 0x10e   :  { %vm196_vm8 = vcmp.eq.s32.totalorder %v195_v6, %v948_v11 }
 0x10f   :  { %v471_v8 = vsel %vm196_vm8, 1.0, %v818_v63  ;;  %587 = vmatmul.mubr.f32.vlgmr.msra.gmra.mrb[0].mxu1 %v356_v5 }
 0x110   :  { %v199_v9 = vadd.f32 %v471_v8, %v192_v7 }
 0x112   :  { %552 = vmatmul.mubr.f32.vlgmr.msra.gmra.mrb[0].mxu0 %v199_v9 }
 0x1e2   :  { %v424_v10 = vpop.f32.mrb[0].mxu1 }
 0x1e3   :  { %v588_v2 = vpop.f32.mrb[1].mxu1 }
 0x1e5   :  { %v267_v12 = vpop.f32.mrb[0].mxu0 }
 0x1e6   :  { %v428_v14 = vadd.f32 %v424_v10, %v267_v12  ;;  %v553_v15 = vpop.f32.mrb[1].mxu0 }
 0x1e8   :  { %v441_v16 = vadd.f32 %v484_v13, %v428_v14 }
 0x1ea   :  { %442 = vst [vmem:[#allocation11] sm:$0xff] %v441_v16 }
 0x1eb   :  { %779 = shalt.err (!%p776_p8)
}
 0x1ec   :  { %s780_s20 = scalar_lea.hbm %s1018_s5, 128 }
 0x1ed   :  { %p781_p9 = scmp.ne.s32.totalorder %s1018_s5, %s780_s20  ;;  %p784_p10 = scmp.lt.u32.totalorder %s780_s20, %s1018_s5 }
 0x1ef   :  { %p786_p11 = pnand %p784_p10, %p781_p9 }
 0x1f1   :  { %789 = shalt.err (!%p786_p11)
}
 0x1f2   :  { %452 = dma.vmem_to_hbm [thread:$0]  %s450_s16, 128, %s1018_s5, [#allocation5]  }
 0x1f3   :  { %796 = dma.done.wait [#allocation5], 128  }
 0x1f4   :  { %797 = vsyncadd [#allocation5], 4294967168 }
 0x1f5   :  { %456 = vsyncpa [#allocation4], 1 }
 0x1f6   :  { %457 = vsyncpa [#allocation7], 1 }
 0x1f7   :  { %458 = vsyncpa [#allocation10], 1 }
 0x1f8   :  { %459 = vsyncpa [#allocation5], 1 }

</bundles_post_ra>
